<compile_context>
chip_gen: v7x
topology: tpu7x:2x2x1
jax: 0.10.0
libtpu: 0.0.40
codegen_flags: <defaults>
</compile_context>

<pallas_src>
import jax
import jax.numpy as jnp
from jax.experimental import pallas as pl
from jax.experimental.pallas import tpu as pltpu

_MIB = 1024 * 1024


def _cdiv(a, b):
    return -(-a // b)


def _device_kind():
    try:
        return jax.devices()[0].device_kind.lower()
    except Exception:
        return ""


def _vmem_capacity_bytes(kind):
    try:
        cap = int(pltpu.get_tpu_info().vmem_capacity_bytes)
        if cap > 0:
            return cap
    except Exception:
        pass
    # Conservative fallbacks: 64 MiB/TC on v7x, 128 MiB elsewhere.
    return 64 * _MIB if "v7" in kind else 128 * _MIB


def _gen_defaults(kind):
    """(target combined streamed bytes per grid step, default num_splits)."""
    if "v7" in kind:            # ~3.2 TB/s HBM, 64 MiB VMEM/TC, 2 TCs/chip
        return 14 * _MIB, 2
    if "v6" in kind:            # ~1.4 TB/s HBM, 128 MiB VMEM, 1 TC
        return 12 * _MIB, 1
    if "v5e" in kind or "v5 lite" in kind or "v5lite" in kind:
        return 4 * _MIB, 1      # ~0.82 TB/s; per-step overhead already <10%
    if "v5" in kind:            # v5p
        return 12 * _MIB, 1
    return 8 * _MIB, 1


def _vmem_limit(block_bytes, vmem_cap):
    """Scoped VMEM budget covering the double-buffered input pair + slack."""
    need = 2 * block_bytes + 4 * _MIB
    return int(min(max(need, 32 * _MIB), int(0.9 * vmem_cap)))


def _pick_row_tile(n_rows, bytes_per_row, target_bytes):
    """Rows per tile so the combined streamed block is ~target_bytes."""
    rows = int(target_bytes // max(1, bytes_per_row))
    if rows >= n_rows:
        return n_rows                 # single full-extent block, no tail mask
    if rows >= 32:
        return (rows // 32) * 32      # bf16(16)/int8(32) sublane packing
    if rows >= 8:
        return (rows // 8) * 8
    # TODO(synk): lane-tile instead of row-tile for extremely wide rows.
    return min(8, n_rows)


def _streaming_view(score, labels):
    """Lane-dense 2D view of score/labels (metadata-only reshape when possible)."""
    t = int(score.size)
    if score.ndim == 2 and score.shape[-1] % 128 == 0:
        return score, labels
    for w in (512, 256, 128):
        if t % w == 0:
            return score.reshape(t // w, w), labels.reshape(t // w, w)
    if score.ndim == 2:
        return score, labels          # lane-padded (D % 128 != 0) fallback
    if score.ndim > 2:
        return (score.reshape(-1, score.shape[-1]),
                labels.reshape(-1, labels.shape[-1]))
    # TODO(synk): pad-and-mask would stream better for huge non-divisible 1-D inputs.
    return score.reshape(1, -1), labels.reshape(1, -1)


# --------------------------------------------------------------------------
# BCE-with-logits mean: streaming reduction kernel
# --------------------------------------------------------------------------
def _make_bce_kernel(n_rows, row_tile, steps_per_split, has_tail):
    def kernel(score_ref, labels_ref, out_ref, acc_ref):
        p = pl.program_id(0)          # parallel split (megacore on v7x)
        i = pl.program_id(1)          # reduction step inside the split

        @pl.when(i == 0)
        def _init():
            acc_ref[...] = jnp.zeros_like(acc_ref)

        x = score_ref[...].astype(jnp.float32)
        y = labels_ref[...].astype(jnp.float32)
        # Numerically stable BCE-with-logits, purely elementwise:
        #   bce(x, y) = max(x, 0) - x*y + log1p(exp(-|x|))
        # NOTE: 2 transcendentals/element; after dtype compression this can
        # become EUP-bound on v7x, which is the algorithmic floor here.
        val = jnp.maximum(x, 0.0) - x * y + jnp.log1p(jnp.exp(-jnp.abs(x)))

        def _fold(v):
            # Fold the tile into the (1, D) f32 accumulator; no reshape, so no
            # risk of a VMEM relayout copy.
            acc_ref[...] += jnp.sum(v, axis=0, keepdims=True)

        if has_tail:
            base = (p * steps_per_split + i) * row_tile
            partial = base + row_tile > n_rows

            @pl.when(jnp.logical_not(partial))
            def _full_tile():
                _fold(val)

            @pl.when(partial)
            def _tail_tile():
                # Keep this a select (NOT a multiply): padded edge rows may
                # hold arbitrary bit patterns (incl. NaN).
                row = (jax.lax.broadcasted_iota(jnp.int32, (val.shape[0], 1), 0)
                       + base)
                _fold(jnp.where(row < n_rows, val, 0.0))
        else:
            _fold(val)

        @pl.when(i == pl.num_programs(1) - 1)
        def _finish():
            out_ref[0, 0] = jnp.sum(acc_ref[...])

    return kernel


# --------------------------------------------------------------------------
# Sum-of-squares: tiled streaming kernel (scales to large embedding tables)
# --------------------------------------------------------------------------
def _make_sumsq_kernel(n_rows, row_tile, has_tail):
    def kernel(x_ref, out_ref, acc_ref):
        i = pl.program_id(0)

        @pl.when(i == 0)
        def _init():
            acc_ref[...] = jnp.zeros_like(acc_ref)

        v = x_ref[...].astype(jnp.float32)
        sq = v * v

        def _fold(s):
            acc_ref[...] += jnp.sum(s, axis=0, keepdims=True)

        if has_tail:
            base = i * row_tile
            partial = base + row_tile > n_rows

            @pl.when(jnp.logical_not(partial))
            def _full_tile():
                _fold(sq)

            @pl.when(partial)
            def _tail_tile():
                row = (jax.lax.broadcasted_iota(jnp.int32, (sq.shape[0], 1), 0)
                       + base)
                _fold(jnp.where(row < n_rows, sq, 0.0))
        else:
            _fold(sq)

        @pl.when(i == pl.num_programs(0) - 1)
        def _finish():
            out_ref[0, 0] = jnp.sum(acc_ref[...])

    return kernel


def _sum_squares(x, *, row_tile=None, target_block_bytes=None):
    """sum(x**2) over all elements, streamed in row tiles."""
    if x.ndim == 2:
        x2 = x
    elif x.ndim > 2:
        x2 = x.reshape(-1, x.shape[-1])
    else:
        x2 = x.reshape(1, -1)
    n, d = x2.shape

    kind = _device_kind()
    vmem_cap = _vmem_capacity_bytes(kind)
    if target_block_bytes is None:
        target_block_bytes = min(8 * _MIB, int(0.35 * vmem_cap))

    bytes_per_row = d * jnp.dtype(x2.dtype).itemsize
    if row_tile is None:
        row_tile = _pick_row_tile(n, bytes_per_row, target_block_bytes)
    else:
        row_tile = min(int(row_tile), n)
        if row_tile < n:
            row_tile = max(8, (row_tile // 8) * 8)

    steps = _cdiv(n, row_tile)
    has_tail = (n % row_tile) != 0
    kernel = _make_sumsq_kernel(n, row_tile, has_tail)

    out = pl.pallas_call(
        kernel,
        out_shape=jax.ShapeDtypeStruct((1, 1), jnp.float32),
        grid_spec=pltpu.PrefetchScalarGridSpec(
            num_scalar_prefetch=0,
            grid=(steps,),
            in_specs=[pl.BlockSpec((row_tile, d), lambda i: (i, 0))],
            out_specs=pl.BlockSpec((1, 1), lambda i: (0, 0),
                                   memory_space=pltpu.SMEM),
            scratch_shapes=[pltpu.VMEM((1, d), jnp.float32)],
        ),
        compiler_params=pltpu.CompilerParams(
            dimension_semantics=("arbitrary",),
            vmem_limit_bytes=_vmem_limit(row_tile * bytes_per_row, vmem_cap)),
        cost_estimate=pl.CostEstimate(
            flops=2 * int(x.size), transcendentals=0,
            bytes_accessed=int(x.size) * jnp.dtype(x.dtype).itemsize + 4),
    )(x2)
    return out[0, 0]


# --------------------------------------------------------------------------
# Public entry point: RGCN_Loss.forward equivalent
# --------------------------------------------------------------------------
def rgcn_loss(score, labels, loss_emb, rel_emb, regularization,
              *, row_tile=None, num_splits=None):
    assert score.shape == labels.shape
    total_elems = int(score.size)

    kind = _device_kind()
    vmem_cap = _vmem_capacity_bytes(kind)
    target_bytes, auto_splits = _gen_defaults(kind)
    target_bytes = min(target_bytes, int(0.35 * vmem_cap))
    if num_splits is None:
        num_splits = auto_splits

    s2d, l2d = _streaming_view(score, labels)
    n, d = s2d.shape

    elem_bytes = (jnp.dtype(score.dtype).itemsize
                  + jnp.dtype(labels.dtype).itemsize)
    bytes_per_row = d * elem_bytes

    if row_tile is None:
        row_tile = _pick_row_tile(n, bytes_per_row, target_bytes)
    else:
        row_tile = min(int(row_tile), n)
        if row_tile < n:
            row_tile = max(8, (row_tile // 8) * 8)

    total_tiles = _cdiv(n, row_tile)
    num_splits = max(1, min(int(num_splits), total_tiles))

    # Keep the split exact: a phantom (clamped) tile is a full redundant HBM
    # fetch.  Nudge the tile size down a little to make total_tiles divisible;
    # otherwise drop the split entirely.
    if num_splits > 1 and total_tiles % num_splits != 0:
        step = 32 if row_tile % 32 == 0 else 8
        rt, fixed = row_tile - step, False
        while rt >= max(step, row_tile // 2):
            if _cdiv(n, rt) % num_splits == 0:
                row_tile, fixed = rt, True
                break
            rt -= step
        if fixed:
            total_tiles = _cdiv(n, row_tile)
        else:
            num_splits = 1
    steps_per_split = total_tiles // num_splits
    has_tail = (n % row_tile) != 0

    kernel = _make_bce_kernel(n, row_tile, steps_per_split, has_tail)
    row_map = lambda p, i: (p * steps_per_split + i, 0)
    block_bytes = row_tile * bytes_per_row

    parts = pl.pallas_call(
        kernel,
        out_shape=jax.ShapeDtypeStruct((num_splits, 1), jnp.float32),
        grid_spec=pltpu.PrefetchScalarGridSpec(
            num_scalar_prefetch=0,
            grid=(num_splits, steps_per_split),
            in_specs=[pl.BlockSpec((row_tile, d), row_map),      # score
                      pl.BlockSpec((row_tile, d), row_map)],     # labels
            out_specs=pl.BlockSpec((1, 1), lambda p, i: (p, 0),
                                   memory_space=pltpu.SMEM),
            scratch_shapes=[pltpu.VMEM((1, d), jnp.float32)],
        ),
        compiler_params=pltpu.CompilerParams(
            dimension_semantics=("parallel", "arbitrary"),
            vmem_limit_bytes=_vmem_limit(block_bytes, vmem_cap)),
        cost_estimate=pl.CostEstimate(
            flops=6 * total_elems,
            transcendentals=2 * total_elems,
            bytes_accessed=total_elems * elem_bytes + 4 * num_splits),
    )(s2d, l2d)

    bce_mean = jnp.sum(parts[:, 0]) / jnp.float32(total_elems)
    reg = (_sum_squares(loss_emb) / jnp.float32(loss_emb.size)
           + _sum_squares(rel_emb) / jnp.float32(rel_emb.size))
    return bce_mean + jnp.float32(regularization) * reg


def _reference(score, labels, loss_emb, rel_emb, regularization):
    x = score.astype(jnp.float32)
    y = labels.astype(jnp.float32)
    bce = jnp.mean(jnp.maximum(x, 0.0) - x * y + jnp.log1p(jnp.exp(-jnp.abs(x))))
    reg = (jnp.mean(loss_emb.astype(jnp.float32) ** 2)
           + jnp.mean(rel_emb.astype(jnp.float32) ** 2))
    return bce + regularization * reg


if __name__ == "__main__":
    key = jax.random.PRNGKey(0)
    ks = jax.random.split(key, 6)

    # Small shapes consistent with the module: decoder logits vs. 0/1 labels,
    # plus entity / relation embedding tables for the regularizer.
    E, R, H = 70, 16, 32
    loss_emb = 0.1 * jax.random.normal(ks[2], (E, H), dtype=jnp.float32)
    rel_emb = 0.1 * jax.random.normal(ks[3], (R, H), dtype=jnp.float32)
    regularization = 0.01

    # Case 1: N*D divisible by 512 -> lane-dense flattened streaming path,
    # int8 labels (exact 0/1) to cut HBM traffic, default tiling.
    N1, D1 = 64, 200
    score1 = jax.random.normal(ks[0], (N1, D1), dtype=jnp.float32)
    labels1 = (jax.random.uniform(ks[1], (N1, D1)) > 0.5).astype(jnp.int8)
    out1 = jax.block_until_ready(
        rgcn_loss(score1, labels1, loss_emb, rel_emb, regularization))
    ref1 = _reference(score1, labels1, loss_emb, rel_emb, regularization)
    assert jnp.allclose(out1, ref1, rtol=1e-5, atol=1e-5), (out1, ref1)

    # Case 2: compressed stream (bf16 score + int8 labels), forced small tiles
    # + 2-way split -> exercises multi-tile streaming, even per-split work and
    # tail masking in the second split (megacore layout on v7x).
    N2, D2 = 128, 200
    score2 = jax.random.normal(ks[4], (N2, D2), dtype=jnp.float32).astype(jnp.bfloat16)
    labels2 = (jax.random.uniform(ks[5], (N2, D2)) > 0.5).astype(jnp.int8)
    out2 = jax.block_until_ready(
        rgcn_loss(score2, labels2, loss_emb, rel_emb, regularization,
                  row_tile=32, num_splits=2))
    ref2 = _reference(score2, labels2, loss_emb, rel_emb, regularization)
    assert jnp.allclose(out2, ref2, rtol=1e-5, atol=1e-5), (out2, ref2)

    # Case 3: D not a lane multiple and N*D not divisible by 128 -> (N, D)
    # fallback path with a full-extent lane block, single full-extent row tile.
    N3, D3 = 72, 200
    score3 = jax.random.normal(ks[0], (N3, D3), dtype=jnp.float32)
    labels3 = (jax.random.uniform(ks[1], (N3, D3)) > 0.5).astype(jnp.float32)
    out3 = jax.block_until_ready(
        rgcn_loss(score3, labels3, loss_emb, rel_emb, regularization))
    ref3 = _reference(score3, labels3, loss_emb, rel_emb, regularization)
    assert jnp.allclose(out3, ref3, rtol=1e-5, atol=1e-5), (out3, ref3)

    # Standalone regularizer reduction with forced tiling -> exercises the
    # multi-tile + partial-tail path of the sum-of-squares kernel.
    ss = jax.block_until_ready(_sum_squares(loss_emb, row_tile=32))
    ss_ref = jnp.sum(loss_emb.astype(jnp.float32) ** 2)
    assert jnp.allclose(ss, ss_ref, rtol=1e-5, atol=1e-5), (ss, ss_ref)

    print("KERNEL_OK")
</pallas_src>

<mosaic_0001>
module attributes {stable_mosaic.version = 11 : i64} {
  func.func @kernel(%arg0: i32, %arg1: i32, %arg2: memref<25x512xf32, #tpu.memory_space<vmem>>, %arg3: memref<25x512xi8, #tpu.memory_space<vmem>>, %arg4: memref<1x1xf32, #tpu.memory_space<smem>>, %arg5: memref<1x512xf32, #tpu.memory_space<vmem>>) attributes {dimension_semantics = [#tpu.dimension_semantics<parallel>, #tpu.dimension_semantics<arbitrary>], iteration_bounds = array<i64: 1, 1>, scalar_prefetch = 0 : i64, scratch_operands = 1 : i64, tpu.core_type = #tpu.core_type<tc>, window_params = [{transform_indices = @transform_0, window_bounds = array<i64: 25, 512>}, {transform_indices = @transform_1, window_bounds = array<i64: 25, 512>}, {transform_indices = @transform_2, window_bounds = array<i64: 1, 1>}]} {
    %c0_i32 = arith.constant 0 : i32
    %0 = arith.cmpi eq, %arg1, %c0_i32 : i32
    %1 = arith.extui %0 : i1 to i32
    %c0_i32_0 = arith.constant 0 : i32
    %2 = arith.cmpi ne, %1, %c0_i32_0 : i32
    scf.if %2 {
      %cst_12 = arith.constant 0.000000e+00 : f32
      %24 = vector.broadcast %cst_12 : f32 to vector<1x512xf32>
      %c0_13 = arith.constant 0 : index
      %c0_14 = arith.constant 0 : index
      %25 = vector.load %arg5[%c0_13, %c0_14] : memref<1x512xf32, #tpu.memory_space<vmem>>, vector<1x512xf32>
      tpu.vector_store %arg5[%c0_13, %c0_14], %24 {strides = array<i32>} : memref<1x512xf32, #tpu.memory_space<vmem>>, vector<1x512xf32>,
    } else {
    }
    %c0 = arith.constant 0 : index
    %c0_1 = arith.constant 0 : index
    %3 = vector.load %arg2[%c0, %c0_1] : memref<25x512xf32, #tpu.memory_space<vmem>>, vector<25x512xf32>
    %c0_2 = arith.constant 0 : index
    %c0_3 = arith.constant 0 : index
    %4 = vector.load %arg3[%c0_2, %c0_3] : memref<25x512xi8, #tpu.memory_space<vmem>>, vector<25x512xi8>
    %5 = arith.sitofp %4 : vector<25x512xi8> to vector<25x512xf32>
    %cst = arith.constant 0.000000e+00 : f32
    %6 = vector.broadcast %cst : f32 to vector<25x512xf32>
    %7 = arith.maximumf %3, %6 : vector<25x512xf32>
    %8 = arith.mulf %3, %5 : vector<25x512xf32>
    %9 = arith.subf %7, %8 : vector<25x512xf32>
    %10 = math.absf %3 : vector<25x512xf32>
    %cst_4 = arith.constant 0.000000e+00 : f32
    %11 = vector.broadcast %cst_4 : f32 to vector<25x512xf32>
    %12 = arith.subf %11, %10 : vector<25x512xf32>
    %13 = math.exp %12 : vector<25x512xf32>
    %14 = math.log1p %13 : vector<25x512xf32>
    %15 = arith.addf %9, %14 : vector<25x512xf32>
    %c0_5 = arith.constant 0 : index
    %c0_6 = arith.constant 0 : index
    %16 = vector.load %arg5[%c0_5, %c0_6] : memref<1x512xf32, #tpu.memory_space<vmem>>, vector<1x512xf32>
    %cst_7 = arith.constant dense<0.000000e+00> : vector<512xf32>
    %17 = vector.multi_reduction <add>, %15, %cst_7 [0] : vector<25x512xf32> to vector<512xf32>
    %18 = vector.shape_cast %17 : vector<512xf32> to vector<1x512xf32>
    %19 = arith.addf %16, %18 : vector<1x512xf32>
    %c0_8 = arith.constant 0 : index
    %c0_9 = arith.constant 0 : index
    %20 = vector.load %arg5[%c0_8, %c0_9] : memref<1x512xf32, #tpu.memory_space<vmem>>, vector<1x512xf32>
    tpu.vector_store %arg5[%c0_8, %c0_9], %19 {strides = array<i32>} : memref<1x512xf32, #tpu.memory_space<vmem>>, vector<1x512xf32>,
    %c0_i32_10 = arith.constant 0 : i32
    %21 = arith.cmpi eq, %arg1, %c0_i32_10 : i32
    %22 = arith.extui %21 : i1 to i32
    %c0_i32_11 = arith.constant 0 : i32
    %23 = arith.cmpi ne, %22, %c0_i32_11 : i32
    scf.if %23 {
      %c0_12 = arith.constant 0 : index
      %c0_13 = arith.constant 0 : index
      %24 = vector.load %arg5[%c0_12, %c0_13] : memref<1x512xf32, #tpu.memory_space<vmem>>, vector<1x512xf32>
      %25 = vector.shape_cast %24 : vector<1x512xf32> to vector<1x1x512xf32>
      %cst_14 = arith.constant dense<0.000000e+00> : vector<1xf32>
      %26 = vector.multi_reduction <add>, %25, %cst_14 [1, 2] : vector<1x1x512xf32> to vector<1xf32>
      %27 = vector.shape_cast %26 : vector<1xf32> to vector<1x1x1xf32>
      %28 = vector.extract %27[0, 0, 0] : f32 from vector<1x1x1xf32>
      %c0_15 = arith.constant 0 : index
      %c0_16 = arith.constant 0 : index
      %29 = memref.load %arg4[%c0_15, %c0_16] : memref<1x1xf32, #tpu.memory_space<smem>>
      memref.store %28, %arg4[%c0_15, %c0_16] : memref<1x1xf32, #tpu.memory_space<smem>>
    } else {
    }
    return
  }
  func.func @transform_0(%arg0: i32, %arg1: i32) -> (i32, i32) {
    %c1_i32 = arith.constant 1 : i32
    %0 = arith.muli %arg0, %c1_i32 : i32
    %1 = arith.addi %0, %arg1 : i32
    %c0_i32 = arith.constant 0 : i32
    %c0_i32_0 = arith.constant 0 : i32
    return %1, %c0_i32 : i32, i32
  }
  func.func @transform_1(%arg0: i32, %arg1: i32) -> (i32, i32) {
    %c1_i32 = arith.constant 1 : i32
    %0 = arith.muli %arg0, %c1_i32 : i32
    %1 = arith.addi %0, %arg1 : i32
    %c0_i32 = arith.constant 0 : i32
    %c0_i32_0 = arith.constant 0 : i32
    return %1, %c0_i32 : i32, i32
  }
  func.func @transform_2(%arg0: i32, %arg1: i32) -> (i32, i32) {
    %c0_i32 = arith.constant 0 : i32
    %c0_i32_0 = arith.constant 0 : i32
    return %arg0, %c0_i32 : i32, i32
  }
}

</mosaic_0001>

<bundles_post_ra>
// kernel: tpu_custom_call.1
= control target key start
LH: loop header
LB: loop body
LE: loop exit
PB: predicated region body
PF: predicated region fallthrough
CT: control target
= control target key end

     0   :  { %7 = vsyncpa [#allocation4], 0  ;;  %s1166_s0 = inlined_call_operand.hbm [shape: f32[25,512], index: 0, kind: input, shape index: {}]   ;;  %s1167_s1 = inlined_call_operand.hbm [shape: s8[25,512], index: 1, kind: input, shape index: {}]   ;;  %s1168_s2 = inlined_call_operand.hbm [shape: f32[1,1], index: 2, kind: output, shape index: {}]  }
   0x1   :  { %8 = vsyncpa [#allocation7], 0 }
   0x2   :  { %9 = vsyncpa [#allocation5], 0  ;;  %s657_s9 = smov [#allocation3]   ;;  %s597_s13 = scalar_lea.hbm %s1166_s0, 2048 }
   0x3   :  { %s20_s10 = sshll.u32 %s657_s9, 4  ;;  %p598_p0 = scmp.ne.s32.totalorder %s1166_s0, %s597_s13  ;;  %s21_s10 = int_to_ptr.vmem [resolvable:$true] %s20_s10 }
   0x4   :  { %p601_p1 = scmp.lt.u32.totalorder %s597_s13, %s1166_s0 }
   0x6   :  { %p603_p2 = pnand %p601_p1, %p598_p0 }
   0x8   :  { %606 = shalt.err (!%p603_p2)
}
   0x9   :  { %s607_s18 = scalar_lea.vmem %s21_s10, 2048  ;;  %p612_p4 = scmp.lt.s32.totalorder %s21_s10, %s21_s10 }
   0xa   :  { %p608_p3 = scmp.ne.s32.totalorder %s21_s10, %s607_s18  ;;  %p613_p5 = scmp.lt.s32.totalorder %s607_s18, %s607_s18 }
   0xc   :  { %p614_p6 = por %p613_p5, %p612_p4 }
   0xe   :  { %p615_p7 = pnand %p614_p6, %p608_p3 }
  0x10   :  { %618 = shalt.err (!%p615_p7)
}
  0x11   :  { %s658_s19 = smov 512   ;;  %s659_s20 = smov 32  }
  0x12   :  { %26 = dma.hbm_to_vmem [thread:$0]  %s1166_s0, 2048, %s21_s10, [#allocation4], %s658_s19, %s658_s19, %s659_s20  }
  0x13   :  { %s660_s23 = smov [#allocation6]   ;;  %s619_s27 = scalar_lea.hbm %s1167_s1, 512 }
  0x14   :  { %s37_s24 = sshll.u32 %s660_s23, 4  ;;  %p620_p8 = scmp.ne.s32.totalorder %s1167_s1, %s619_s27  ;;  %s38_s24 = int_to_ptr.vmem [resolvable:$true] %s37_s24 }
  0x15   :  { %p623_p9 = scmp.lt.u32.totalorder %s619_s27, %s1167_s1 }
  0x17   :  { %p625_p10 = pnand %p623_p9, %p620_p8 }
  0x19   :  { %628 = shalt.err (!%p625_p10)
}
  0x1a   :  { %s629_s4 = scalar_lea.vmem %s38_s24, 512  ;;  %p634_p12 = scmp.lt.s32.totalorder %s38_s24, %s38_s24 }
  0x1b   :  { %p630_p11 = scmp.ne.s32.totalorder %s38_s24, %s629_s4  ;;  %p635_p13 = scmp.lt.s32.totalorder %s629_s4, %s629_s4 }
  0x1d   :  { %p636_p0 = por %p635_p13, %p634_p12 }
  0x1f   :  { %p637_p1 = pnand %p636_p0, %p630_p11 }
  0x21   :  { %640 = shalt.err (!%p637_p1)
}
  0x22   :  { %s661_s0 = smov 128   ;;  %s662_s5 = smov 8  }
  0x23   :  { %43 = dma.hbm_to_vmem [thread:$0]  %s1167_s1, 512, %s38_s24, [#allocation7], %s661_s0, %s661_s0, %s662_s5  }
  0x24   :  { %651 = dma.done.wait [#allocation4], 2048  }
  0x25   :  { %652 = vsyncadd [#allocation4], 4294965248 }
  0x26   :  { %653 = dma.done.wait [#allocation7], 512  }
  0x27   :  { %654 = vsyncadd [#allocation7], 4294966784  ;;  %v1169_v0 = vlaneseq  ;;  %v663_v2 = vmov 0.0   ;;  %v712_v3 = vld [vmem:[#allocation3] sm:$0xff]  ;;  %v714_v4 = vld [vmem:[#allocation3 + $0x8] sm:$0xff]  ;;  %vm390_vm13 = vcmask 1040384  }
  0x28   :  { %v716_v5 = vld [vmem:[#allocation3 + $0x10] sm:$0xff]  ;;  %v718_v6 = vld [vmem:[#allocation3 + $0x18] sm:$0xff]  ;;  %v720_v7 = vld [vmem:[#allocation3 + $0x20] sm:$0xff]  ;;  %v115_v11 = vmax.f32 %v712_v3, 0.0  ;;  %v116_v12 = vmax.f32 %v714_v4, 0.0  ;;  %s641_s10 = scalar_lea.hbm %s1168_s2, 16 }
  0x29   :  { %vm706_vm0 = vcmp.lt.s32.totalorder %v1169_v0, 512  ;;  %v722_v8 = vld [vmem:[#allocation3 + $0x28] sm:$0xff]  ;;  %v724_v9 = vld [vmem:[#allocation3 + $0x30] sm:$0xff]  ;;  %v79_v10 = vld [vmem:[#allocation6] sm:$0xff]  ;;  %v117_v16 = vmax.f32 %v716_v5, 0.0  ;;  %v118_v17 = vmax.f32 %v718_v6, 0.0  ;;  %p642_p2 = scmp.ne.s32.totalorder %s1168_s2, %s641_s10  ;;  %p645_p3 = scmp.lt.u32.totalorder %s641_s10, %s1168_s2 }
  0x2a   :  { %62 = vst.msk [vmem:[#allocation2] sm:$0xf] %vm706_vm0, %v663_v2  ;;  %v728_v13 = vld [vmem:[#allocation3 + $0x38] sm:$0xff]  ;;  %v730_v14 = vld [vmem:[#allocation3 + $0x40] sm:$0xff]  ;;  %v80_v15 = vld [vmem:[#allocation6 + $0x8] sm:$0xff]  ;;  %v119_v18 = vmax.f32 %v720_v7, 0.0  ;;  %v83_v26 = vunpack.c.0.s8 %v79_v10  ;;  %v84_v30 = vunpack.c.1.s8 %v79_v10  ;;  %v85_v31 = vunpack.c.2.s8 %v79_v10 }
  0x2b   :  { %v735_v19 = vld [vmem:[#allocation3 + $0x48] sm:$0xff]  ;;  %v737_v20 = vld [vmem:[#allocation3 + $0x50] sm:$0xff]  ;;  %v120_v22 = vmax.f32 %v722_v8, 0.0  ;;  %v82_v25 = vld [vmem:[#allocation6 + $0x18] sm:$0x55]  ;;  %v86_v32 = vunpack.c.3.s8 %v79_v10  ;;  %v87_v33 = vunpack.c.0.s8 %v80_v15  ;;  %v88_v34 = vunpack.c.1.s8 %v80_v15  ;;  %p647_p4 = pnand %p645_p3, %p642_p2 }
  0x2c   :  { %v81_v21 = vld [vmem:[#allocation6 + $0x10] sm:$0xff]  ;;  %v89_v35 = vunpack.c.2.s8 %v80_v15  ;;  %v90_v36 = vunpack.c.3.s8 %v80_v15  ;;  %v95_v41 = vunpack.c.0.s8 %v82_v25  ;;  %v96_v42 = vunpack.c.1.s8 %v82_v25  ;;  %v745_v54 = vld [vmem:[#allocation3 + $0x58] sm:$0xff]  ;;  %v747_v55 = vld [vmem:[#allocation3 + $0x60] sm:$0x1] }
  0x2d   :  { %v91_v37 = vunpack.c.0.s8 %v81_v21  ;;  %v92_v38 = vunpack.c.1.s8 %v81_v21  ;;  %v93_v39 = vunpack.c.2.s8 %v81_v21  ;;  %v94_v40 = vunpack.c.3.s8 %v81_v21  ;;  %v749_v56 = vld [vmem:[#allocation3 + $0x68] sm:$0x1]  ;;  %v753_v61 = vld [vmem:[#allocation3 + $0x70] sm:$0x1]  ;;  %v755_v62 = vld [vmem:[#allocation3 + $0x78] sm:$0x1] }
  0x2e   :  { %v97_v43 = vunpack.c.2.s8 %v82_v25  ;;  %v98_v44 = vunpack.c.3.s8 %v82_v25  ;;  %v99_v45 = vcvt.s32.f32 %v83_v26  ;;  %v100_v46 = vcvt.s32.f32 %v84_v30 }
  0x2f   :  { %v101_v47 = vcvt.s32.f32 %v85_v31  ;;  %v102_v48 = vcvt.s32.f32 %v86_v32  ;;  %v103_v49 = vcvt.s32.f32 %v87_v33  ;;  %v104_v50 = vcvt.s32.f32 %v88_v34 }
  0x30   :  { %v105_v51 = vcvt.s32.f32 %v89_v35  ;;  %v106_v52 = vcvt.s32.f32 %v90_v36  ;;  %v107_v53 = vcvt.s32.f32 %v91_v37  ;;  %v108_v57 = vcvt.s32.f32 %v92_v38 }
  0x31   :  { %v109_v58 = vcvt.s32.f32 %v93_v39  ;;  %v110_v59 = vcvt.s32.f32 %v94_v40  ;;  %v751_v60 = vcvt.s32.f32 %v95_v41  ;;  %v757_v63 = vcvt.s32.f32 %v96_v42 }
  0x32   :  { %v759_v2 = vcvt.s32.f32 %v97_v43  ;;  %v761_v10 = vcvt.s32.f32 %v98_v44  ;;  %v163_v26 = vand.u32 2147483647, %v712_v3  ;;  %v164_v30 = vand.u32 2147483647, %v714_v4 }
  0x33   :  { %v165_v33 = vand.u32 2147483647, %v716_v5  ;;  %v166_v34 = vand.u32 2147483647, %v718_v6  ;;  %v773_v35 = vmul.f32 %v99_v45, %v712_v3  ;;  %v776_v36 = vmul.f32 %v100_v46, %v714_v4 }
  0x34   :  { %v779_v37 = vmul.f32 %v101_v47, %v716_v5  ;;  %v167_v38 = vand.u32 2147483647, %v720_v7  ;;  %v783_v39 = vmul.f32 %v102_v48, %v718_v6  ;;  %v786_v40 = vmul.f32 %v103_v49, %v720_v7 }
  0x35   :  { %v789_v41 = vmul.f32 %v104_v50, %v722_v8  ;;  %v168_v42 = vand.u32 2147483647, %v722_v8  ;;  %v793_v43 = vmul.f32 %v105_v51, %v724_v9  ;;  %v169_v44 = vand.u32 2147483647, %v724_v9 }
  0x36   :  { %v179_v45 = vsub.f32 0.0, %v163_v26  ;;  %v180_v46 = vsub.f32 0.0, %v164_v30  ;;  %v797_v47 = vmul.f32 %v106_v52, %v728_v13  ;;  %v170_v48 = vand.u32 2147483647, %v728_v13 }
  0x37   :  { %v181_v0 = vsub.f32 0.0, %v165_v33  ;;  %v182_v49 = vsub.f32 0.0, %v166_v34  ;;  %v801_v32 = vmul.f32 %v107_v53, %v730_v14  ;;  %v171_v50 = vand.u32 2147483647, %v730_v14 }
  0x38   :  { %v172_v31 = vand.u32 2147483647, %v735_v19  ;;  %v183_v51 = vsub.f32 0.0, %v167_v38  ;;  %v806_v25 = vmul.f32 %v108_v57, %v735_v19  ;;  %v173_v26 = vand.u32 2147483647, %v737_v20 }
  0x39   :  { %v174_v52 = vand.u32 2147483647, %v745_v54  ;;  %v184_v30 = vsub.f32 0.0, %v168_v42  ;;  %v811_v21 = vmul.f32 %v109_v58, %v737_v20  ;;  %v185_v33 = vsub.f32 0.0, %v169_v44 }
  0x3a   :  { %v195_v34 = vmul.f32 1.442695, %v179_v45  ;;  %v197_v53 = vmul.f32 1.442695, %v180_v46  ;;  %v814_v15 = vmul.f32 %v110_v59, %v745_v54  ;;  %v186_v29 = vsub.f32 0.0, %v170_v48 }
  0x3b   :  { %v199_v28 = vmul.f32 1.442695, %v181_v0  ;;  %v201_v38 = vmul.f32 1.442695, %v182_v49  ;;  %v175_v57 = vand.u32 2147483647, %v747_v55  ;;  %v143_v49 = vmul.f32 %v751_v60, %v747_v55 }
  0x3c   :  { %v187_v27 = vsub.f32 0.0, %v171_v50  ;;  %533 = vpow2.f32 %v195_v34  ;;  %v203_v24 = vmul.f32 1.442695, %v183_v51  ;;  %v176_v23 = vand.u32 2147483647, %v749_v56 }
  0x3d   :  { %v188_v42 = vsub.f32 0.0, %v172_v31  ;;  %535 = vpow2.f32 %v197_v53  ;;  %v205_v58 = vmul.f32 1.442695, %v184_v30  ;;  %v177_v44 = vand.u32 2147483647, %v753_v61 }
  0x3e   :  { %v189_v45 = vsub.f32 0.0, %v173_v26  ;;  %537 = vpow2.f32 %v199_v28  ;;  %v207_v46 = vmul.f32 1.442695, %v185_v33  ;;  %v178_v59 = vand.u32 2147483647, %v755_v62 }
  0x3f   :  { %v190_v48 = vsub.f32 0.0, %v174_v52  ;;  %539 = vpow2.f32 %v201_v38  ;;  %v209_v0 = vmul.f32 1.442695, %v186_v29  ;;  %v191_v50 = vsub.f32 0.0, %v175_v57 }
  0x40   :  { %541 = vpow2.f32 %v203_v24  ;;  %v211_v51 = vmul.f32 1.442695, %v187_v27  ;;  %v144_v31 = vmul.f32 %v757_v63, %v749_v56  ;;  %v192_v30 = vsub.f32 0.0, %v176_v23 }
  0x41   :  { %543 = vpow2.f32 %v205_v58  ;;  %v213_v34 = vmul.f32 1.442695, %v188_v42  ;;  %v145_v28 = vmul.f32 %v759_v2, %v753_v61  ;;  %v193_v26 = vsub.f32 0.0, %v177_v44 }
  0x42   :  { %545 = vpow2.f32 %v207_v46  ;;  %v215_v52 = vmul.f32 1.442695, %v189_v45  ;;  %v828_v29 = vmul.f32 %v761_v10, %v755_v62  ;;  %v194_v60 = vsub.f32 0.0, %v178_v59 }
  0x43   :  { %547 = vpow2.f32 %v209_v0  ;;  %v217_v24 = vmul.f32 1.442695, %v190_v48  ;;  %v833_v27 = vsub.f32 %v115_v11, %v773_v35  ;;  %v838_v23 = vsub.f32 %v116_v12, %v776_v36 }
  0x44   :  { %549 = vpow2.f32 %v211_v51  ;;  %v219_v63 = vmul.f32 1.442695, %v191_v50  ;;  %v843_v2 = vsub.f32 %v117_v16, %v779_v37  ;;  %v848_v10 = vsub.f32 %v118_v17, %v783_v39 }
  0x45   :  { %551 = vpow2.f32 %v213_v34  ;;  %v221_v3 = vmul.f32 1.442695, %v192_v30  ;;  %v853_v4 = vsub.f32 %v119_v18, %v786_v40  ;;  %v858_v12 = vsub.f32 %v120_v22, %v789_v41 }
  0x46   :  { %v534_v11 = vpop.eup %533  ;;  %553 = vpow2.f32 %v215_v52  ;;  %v223_v5 = vmul.f32 1.442695, %v193_v26  ;;  %v1172_v6 = vmax.f32 %v724_v9, 0.0  ;;  %v225_v35 = vmul.f32 1.442695, %v194_v60 }
  0x47   :  { %v536_v16 = vpop.eup %535  ;;  %555 = vpow2.f32 %v217_v24  ;;  %v230_v36 = vmul.f32 -0.5, %v534_v11  ;;  %v1173_v7 = vmax.f32 %v728_v13, 0.0  ;;  %v1174_v8 = vmax.f32 %v730_v14, 0.0 }
  0x48   :  { %v863_v17 = vsub.f32 %v1172_v6, %v793_v43  ;;  %v865_v37 = vpop.eup %537  ;;  %557 = vpow2.f32 %v219_v63  ;;  %v227_v39 = vadd.f32 1.0, %v534_v11  ;;  %v1175_v40 = vmax.f32 %v735_v19, 0.0 }
  0x49   :  { %v870_v18 = vsub.f32 %v1173_v7, %v797_v47  ;;  %v875_v22 = vsub.f32 %v1174_v8, %v801_v32  ;;  %v540_v9 = vpop.eup %539  ;;  %v1176_v43 = vmax.f32 %v737_v20, 0.0  ;;  %559 = vpow2.f32 %v221_v3 }
  0x4a   :  { %v880_v41 = vsub.f32 %v1175_v40, %v806_v25  ;;  %v236_v13 = vadd.f32 1.0, %v536_v16  ;;  %v887_v47 = vpop.eup %541  ;;  %v1177_v14 = vmax.f32 %v745_v54, 0.0  ;;  %561 = vpow2.f32 %v223_v5 }
  0x4b   :  { %v885_v33 = vsub.f32 %v1176_v43, %v811_v21  ;;  %v239_v53 = vmul.f32 -0.5, %v536_v16  ;;  %v245_v19 = vadd.f32 1.0, %v865_v37  ;;  %v895_v25 = vpop.eup %543  ;;  %v1178_v38 = vmax.f32 %v747_v55, 0.0 }
  0x4c   :  { %v892_v32 = vsub.f32 %v1177_v14, %v814_v15  ;;  %563 = vpow2.f32 %v225_v35  ;;  %v231_v21 = vadd.f32 1.0, %v230_v36  ;;  %v254_v57 = vadd.f32 1.0, %v540_v9  ;;  %v901_v42 = vpop.eup %545 }
  0x4d   :  { %v899_v20 = vsub.f32 %v1178_v38, %v143_v49  ;;  %565 = vlog2.f32 %v227_v39  ;;  %v233_v58 = vand.u32 2147483647, %v534_v11  ;;  %v248_v54 = vmul.f32 -0.5, %v865_v37  ;;  %v904_v44 = vpop.eup %547 }
  0x4e   :  { %v257_v15 = vmul.f32 -0.5, %v540_v9  ;;  %v1179_v45 = vmax.f32 %v749_v56, 0.0  ;;  %567 = vlog2.f32 %v236_v13  ;;  %v242_v55 = vand.u32 2147483647, %v536_v16  ;;  %v911_v48 = vpop.eup %549 }
  0x4f   :  { %v263_v59 = vadd.f32 1.0, %v887_v47  ;;  %v240_v0 = vadd.f32 1.0, %v239_v53  ;;  %569 = vlog2.f32 %v245_v19  ;;  %v251_v49 = vand.u32 2147483647, %v865_v37  ;;  %v915_v51 = vpop.eup %551 }
  0x50   :  { %v908_v46 = vsub.f32 %v1179_v45, %v144_v31  ;;  %v266_v50 = vmul.f32 -0.5, %v887_v47  ;;  %v1180_v30 = vmax.f32 %v753_v61, 0.0  ;;  %v921_v56 = vmul.f32 %v534_v11, %v231_v21  ;;  %v924_v26 = vpop.eup %553 }
  0x51   :  { %571 = vlog2.f32 %v254_v57  ;;  %v272_v31 = vadd.f32 1.0, %v895_v25  ;;  %vm926_vm1 = vcmp.lt.f32.partialorder %v233_v58, 0.0004427343  ;;  %v249_v60 = vadd.f32 1.0, %v248_v54  ;;  %v930_v3 = vpop.eup %555 }
  0x52   :  { %v919_v34 = vsub.f32 %v1180_v30, %v145_v28  ;;  %v258_v24 = vadd.f32 1.0, %v257_v15  ;;  %v260_v63 = vand.u32 2147483647, %v540_v9  ;;  %573 = vlog2.f32 %v263_v59  ;;  %v935_v5 = vpop.eup %557 }
  0x53   :  { %v269_v61 = vand.u32 2147483647, %v887_v47  ;;  %575 = vlog2.f32 %v272_v31  ;;  %v275_v28 = vmul.f32 -0.5, %v895_v25  ;;  %v281_v11 = vadd.f32 1.0, %v901_v42  ;;  %v948_v39 = vpop.eup %559 }
  0x54   :  { %v937_v6 = vmul.f32 %v536_v16, %v240_v0  ;;  %vm939_vm2 = vcmp.lt.f32.partialorder %v242_v55, 0.0004427343  ;;  %vm943_vm3 = vcmp.lt.f32.partialorder %v251_v49, 0.0004427343  ;;  %v267_v7 = vadd.f32 1.0, %v266_v50  ;;  %v953_v13 = vpop.eup %561 }
  0x55   :  { %v284_v8 = vmul.f32 -0.5, %v901_v42  ;;  %v278_v40 = vand.u32 2147483647, %v895_v25  ;;  %577 = vlog2.f32 %v281_v11  ;;  %v290_v43 = vadd.f32 1.0, %v904_v44 }
  0x56   :  { %v293_v16 = vmul.f32 -0.5, %v904_v44  ;;  %v956_v14 = vmul.f32 %v865_v37, %v249_v60  ;;  %v958_v53 = vmul.f32 %v540_v9, %v258_v24  ;;  %vm960_vm4 = vcmp.lt.f32.partialorder %v260_v63, 0.0004427343  ;;  %v965_v21 = vpop.eup %563 }
  0x57   :  { %v287_v38 = vand.u32 2147483647, %v901_v42  ;;  %vm967_vm5 = vcmp.lt.f32.partialorder %v269_v61, 0.0004427343  ;;  %v276_v58 = vadd.f32 1.0, %v275_v28  ;;  %579 = vlog2.f32 %v290_v43  ;;  %v566_v9 = vpop.eup %565 }
  0x58   :  { %v299_v54 = vadd.f32 1.0, %v911_v48  ;;  %v302_v37 = vmul.f32 -0.5, %v911_v48  ;;  %v974_v15 = vmul.f32 %v887_v47, %v267_v7  ;;  %v285_v45 = vadd.f32 1.0, %v284_v8  ;;  %v568_v0 = vpop.eup %567 }
  0x59   :  { %v296_v55 = vand.u32 2147483647, %v904_v44  ;;  %v308_v59 = vadd.f32 1.0, %v915_v51  ;;  %v978_v49 = vmul.f32 0.6931472, %v566_v9  ;;  %v294_v30 = vadd.f32 1.0, %v293_v16  ;;  %v570_v31 = vpop.eup %569 }
  0x5a   :  { %vm980_vm6 = vcmp.lt.f32.partialorder %v278_v40, 0.0004427343  ;;  %581 = vlog2.f32 %v299_v54  ;;  %vm984_vm7 = vcmp.lt.f32.partialorder %v287_v38, 0.0004427343  ;;  %v305_v47 = vand.u32 2147483647, %v911_v48 }
  0x5b   :  { %583 = vlog2.f32 %v308_v59  ;;  %v311_v24 = vmul.f32 -0.5, %v915_v51  ;;  %v572_v63 = vpop.eup %571  ;;  %v990_v61 = vmul.f32 0.6931472, %v568_v0  ;;  %v992_v28 = vmul.f32 0.6931472, %v570_v31 }
  0x5c   :  { %v995_v11 = vmul.f32 %v895_v25, %v276_v58  ;;  %v303_v7 = vadd.f32 1.0, %v302_v37  ;;  %v574_v8 = vpop.eup %573  ;;  %v998_v40 = vmul.f32 %v901_v42, %v285_v45  ;;  %vm1000_vm8 = vcmp.lt.f32.partialorder %v296_v55, 0.0004427343 }
  0x5d   :  { %v314_v16 = vand.u32 2147483647, %v915_v51  ;;  %v317_v38 = vadd.f32 1.0, %v924_v26  ;;  %v576_v54 = vpop.eup %575  ;;  %v235_v25 = vsel %vm926_vm1, %v921_v56, %v978_v49  ;;  %v1010_v58 = vmul.f32 0.6931472, %v572_v63 }
  0x5e   :  { %v1013_v37 = vmul.f32 %v904_v44, %v294_v30  ;;  %v320_v42 = vmul.f32 -0.5, %v924_v26  ;;  %v1016_v9 = vmul.f32 0.6931472, %v574_v8  ;;  %v1018_v45 = vmul.f32 0.6931472, %v576_v54 }
  0x5f   :  { %vm1020_vm9 = vcmp.lt.f32.partialorder %v305_v47, 0.0004427343  ;;  %v312_v59 = vadd.f32 1.0, %v311_v24  ;;  %585 = vlog2.f32 %v317_v38  ;;  %v578_v0 = vpop.eup %577  ;;  %v244_v31 = vsel %vm939_vm2, %v937_v6, %v990_v61 }
  0x60   :  { %v253_v44 = vsel %vm943_vm3, %v956_v14, %v992_v28  ;;  %v1033_v30 = vmul.f32 %v911_v48, %v303_v7  ;;  %v326_v47 = vadd.f32 1.0, %v930_v3  ;;  %vm1036_vm10 = vcmp.lt.f32.partialorder %v314_v16, 0.0004427343 }
  0x61   :  { %v321_v24 = vadd.f32 1.0, %v320_v42  ;;  %v323_v8 = vand.u32 2147483647, %v924_v26  ;;  %v329_v35 = vmul.f32 -0.5, %v930_v3  ;;  %v580_v6 = vpop.eup %579  ;;  %v262_v61 = vsel %vm960_vm4, %v958_v53, %v1010_v58 }
  0x62   :  { %v283_v38 = vmul.f32 0.6931472, %v578_v0  ;;  %587 = vlog2.f32 %v326_v47  ;;  %v335_v48 = vadd.f32 1.0, %v935_v5  ;;  %v271_v7 = vsel %vm967_vm5, %v974_v15, %v1016_v9 }
  0x63   :  { %v280_v16 = vsel %vm980_vm6, %v995_v11, %v1018_v45  ;;  %v313_v54 = vmul.f32 %v915_v51, %v312_v59  ;;  %v332_v42 = vand.u32 2147483647, %v930_v3  ;;  %v292_v53 = vmul.f32 0.6931472, %v580_v6 }
  0x64   :  { %v582_v19 = vpop.eup %581  ;;  %589 = vlog2.f32 %v335_v48  ;;  %v338_v58 = vmul.f32 -0.5, %v935_v5  ;;  %v344_v0 = vadd.f32 1.0, %v948_v39  ;;  %v322_v57 = vmul.f32 %v924_v26, %v321_v24 }
  0x65   :  { %v584_v47 = vpop.eup %583  ;;  %vm1060_vm11 = vcmp.lt.f32.partialorder %v323_v8, 0.0004427343  ;;  %v330_v50 = vadd.f32 1.0, %v329_v35  ;;  %v347_v11 = vmul.f32 -0.5, %v948_v39  ;;  %v289_v51 = vsel %vm984_vm7, %v998_v40, %v283_v38 }
  0x66   :  { %v301_v9 = vmul.f32 0.6931472, %v582_v19  ;;  %v341_v45 = vand.u32 2147483647, %v935_v5  ;;  %591 = vlog2.f32 %v344_v0  ;;  %v310_v59 = vmul.f32 0.6931472, %v584_v47 }
  0x67   :  { %v339_v6 = vadd.f32 1.0, %v338_v58  ;;  %v348_v48 = vadd.f32 1.0, %v347_v11  ;;  %v353_v26 = vadd.f32 1.0, %v953_v13  ;;  %v298_v24 = vsel %vm1000_vm8, %v1013_v37, %v292_v53 }
  0x68   :  { %vm1073_vm12 = vcmp.lt.f32.partialorder %v332_v42, 0.0004427343  ;;  %v350_v60 = vand.u32 2147483647, %v948_v39  ;;  %v356_v40 = vmul.f32 -0.5, %v953_v13  ;;  %v331_v38 = vmul.f32 %v930_v3, %v330_v50 }
  0x69   :  { %v586_v35 = vpop.eup %585  ;;  %593 = vlog2.f32 %v353_v26  ;;  %v359_v19 = vand.u32 2147483647, %v953_v13  ;;  %v362_v58 = vadd.f32 1.0, %v965_v21  ;;  %v307_v43 = vsel %vm1020_vm9, %v1033_v30, %v301_v9 }
  0x6a   :  { %v319_v37 = vmul.f32 0.6931472, %v586_v35  ;;  %vm1085_vm14 = vcmp.lt.f32.partialorder %v341_v45, 0.0004427343  ;;  %v365_v53 = vmul.f32 -0.5, %v965_v21  ;;  %v316_v3 = vsel %vm1036_vm10, %v313_v54, %v310_v59 }
  0x6b   :  { %v340_v0 = vmul.f32 %v935_v5, %v339_v6  ;;  %v349_v47 = vmul.f32 %v948_v39, %v348_v48  ;;  %595 = vlog2.f32 %v362_v58  ;;  %vm1094_vm15 = vcmp.lt.f32.partialorder %v350_v60, 0.0004427343 }
  0x6c   :  { %v588_v50 = vpop.eup %587  ;;  %v357_v55 = vadd.f32 1.0, %v356_v40  ;;  %v371_v30 = vadd.f32 %v235_v25, %v833_v27  ;;  %v372_v63 = vadd.f32 %v244_v31, %v838_v23  ;;  %v325_v5 = vsel %vm1060_vm11, %v322_v57, %v319_v37 }
  0x6d   :  { %v328_v39 = vmul.f32 0.6931472, %v588_v50  ;;  %vm1107_vm2 = vcmp.lt.f32.partialorder %v359_v19, 0.0004427343  ;;  %v375_v9 = vadd.f32 %v271_v7, %v853_v4  ;;  %v366_v59 = vadd.f32 1.0, %v365_v53 }
  0x6e   :  { %v590_v45 = vpop.eup %589  ;;  %v373_v27 = vadd.f32 %v253_v44, %v843_v2  ;;  %v376_v23 = vadd.f32 %v280_v16, %v858_v12  ;;  %v377_v56 = vadd.f32 %v289_v51, %v863_v17  ;;  %v374_v49 = vadd.f32 %v262_v61, %v848_v10 }
  0x6f   :  { %v337_v52 = vmul.f32 0.6931472, %v590_v45  ;;  %v379_v25 = vadd.f32 %v307_v43, %v875_v22  ;;  %v380_v4 = vadd.f32 %v316_v3, %v880_v41  ;;  %v334_v7 = vsel %vm1073_vm12, %v331_v38, %v328_v39 }
  0x70   :  { %v592_v31 = vpop.eup %591  ;;  %v378_v36 = vadd.f32 %v298_v24, %v870_v18  ;;  %v388_v57 = vadd.f32 %v375_v9, %v371_v30  ;;  %v399_v14 = vadd.f32 %v376_v23, %v372_v63  ;;  %v358_v17 = vmul.f32 %v953_v13, %v357_v55 }
  0x71   :  { %v343_v2 = vsel %vm1085_vm14, %v340_v0, %v337_v52  ;;  %v346_v12 = vmul.f32 0.6931472, %v592_v31  ;;  %v368_v10 = vand.u32 2147483647, %v965_v21  ;;  %v381_v22 = vadd.f32 %v325_v5, %v885_v33 }
  0x72   :  { %v383_v41 = vadd.f32 %v343_v2, %v899_v20  ;;  %v389_v28 = vadd.f32 %v388_v57, %v379_v25  ;;  %v409_v44 = vadd.f32 %v377_v56, %v373_v27  ;;  %v367_v16 = vmul.f32 %v965_v21, %v366_v59 }
  0x73   :  { %v594_v61 = vpop.eup %593  ;;  %v352_v18 = vsel %vm1094_vm15, %v349_v47, %v346_v12  ;;  %v382_v15 = vadd.f32 %v334_v7, %v892_v32  ;;  %v400_v51 = vadd.f32 %v399_v14, %v380_v4  ;;  %v419_v26 = vadd.f32 %v378_v36, %v374_v49 }
  0x74   :  { %v355_v6 = vmul.f32 0.6931472, %v594_v61  ;;  %v384_v13 = vadd.f32 %v352_v18, %v908_v46  ;;  %v391_v48 = vsel %vm390_vm13, %v383_v41, 0.0  ;;  %v1211_v20 = vmax.f32 %v755_v62, 0.0 }
  0x75   :  { %v596_v33 = vpop.eup %595  ;;  %vm369_vm1 = vcmp.lt.f32.partialorder %v368_v10, 0.0004427343  ;;  %v392_v8 = vadd.f32 %v391_v48, %v389_v28  ;;  %v410_v40 = vadd.f32 %v409_v44, %v381_v22  ;;  %v420_v58 = vadd.f32 %v419_v26, %v382_v15  ;;  %v387_v28 = vld [vmem:[#allocation2] sm:$0xf] }
  0x76   :  { %v162_v24 = vsub.f32 %v1211_v20, %v828_v29  ;;  %v361_v60 = vsel %vm1107_vm2, %v358_v17, %v355_v6  ;;  %v364_v21 = vmul.f32 0.6931472, %v596_v33  ;;  %v401_v32 = vsel %vm390_vm13, %v384_v13, 0.0 }
  0x77   :  { %v385_v35 = vadd.f32 %v361_v60, %v919_v34  ;;  %v393_v46 = vrot.slane %v392_v8, 4  ;;  %v402_v38 = vadd.f32 %v401_v32, %v400_v51  ;;  %v664_v63 = vmov 1966171168  }
  0x78   :  { %v370_v19 = vsel %vm369_vm1, %v367_v16, %v364_v21  ;;  %v436_v5 = vunpack.c.l.s4 %v664_v63  ;;  %v1212_v27 = vlaneseq }
  0x79   :  { %v386_v43 = vadd.f32 %v370_v19, %v162_v24  ;;  %v394_v37 = vadd.f32 %v393_v46, %v392_v8  ;;  %v403_v42 = vrot.slane %v402_v38, 4  ;;  %v411_v62 = vsel %vm390_vm13, %v385_v35, 0.0 }
  0x7a   :  { %v412_v29 = vadd.f32 %v411_v62, %v410_v40  ;;  %v439_v23 = vshrl.u32 %v1212_v27, 7  ;;  %v437_v25 = vunpack.c.0.s8 %v436_v5 }
  0x7b   :  { %v395_v53 = vrot.slane %v394_v37, 2  ;;  %v404_v3 = vadd.f32 %v403_v42, %v402_v38  ;;  %v421_v0 = vsel %vm390_vm13, %v386_v43, 0.0 }
  0x7c   :  { %v413_v47 = vrot.slane %v412_v29, 4  ;;  %v422_v50 = vadd.f32 %v421_v0, %v420_v58  ;;  %v440_v2 = vsub.s32 %v437_v25, %v439_v23  ;;  %v471_v18 = vsub.s32 0, %v439_v23 }
  0x7d   :  { %v396_v11 = vadd.f32 %v395_v53, %v394_v37  ;;  %v405_v55 = vrot.slane %v404_v3, 2  ;;  %v475_v16 = vsub.s32 1, %v439_v23  ;;  %v479_v15 = vsub.s32 2, %v439_v23 }
  0x7e   :  { %v414_v30 = vadd.f32 %v413_v47, %v412_v29  ;;  %v423_v34 = vrot.slane %v422_v50, 4  ;;  %v483_v51 = vsub.s32 3, %v439_v23 }
  0x7f   :  { %v397_v39 = vrot.slane %v396_v11, 1  ;;  %v406_v54 = vadd.f32 %v405_v55, %v404_v3 }
  0x80   :  { %v415_v9 = vrot.slane %v414_v30, 2  ;;  %v424_v45 = vadd.f32 %v423_v34, %v422_v50 }
  0x81   :  { %v407_v59 = vrot.slane %v406_v54, 1  ;;  %v398_v56 = vadd.f32 %v397_v39, %v396_v11 }
  0x82   :  { %v416_v52 = vadd.f32 %v415_v9, %v414_v30  ;;  %v425_v49 = vrot.slane %v424_v45, 2 }
  0x83   :  { %v408_v4 = vadd.f32 %v407_v59, %v406_v54 }
  0x84   :  { %v417_v31 = vrot.slane %v416_v52, 1  ;;  %v426_v7 = vadd.f32 %v425_v49, %v424_v45 }
  0x85   :  { %v433_v14 = vcombine.low %v398_v56, %v408_v4 }
  0x86   :  { %v418_v36 = vadd.f32 %v417_v31, %v416_v52  ;;  %v427_v57 = vrot.slane %v426_v7, 1 }
  0x87   :  { %v441_v10 = vrot.slane %v433_v14, %v440_v2 }
  0x88   :  { %v428_v12 = vadd.f32 %v427_v57, %v426_v7 }
  0x8a   :  { %v434_v17 = vcombine.low %v418_v36, %v428_v12 }
  0x8c   :  { %v448_v22 = vrot.slane %v434_v17, %v440_v2 }
  0x8e   :  { %v449_v41 = vcombine.low %v441_v10, %v448_v22 }
  0x90   :  { %v456_v44 = vrot.slane %v449_v41, %v440_v2 }
  0x92   :  { %v458_v61 = vadd.f32 %v456_v44, %v387_v28 }
  0x94   :  { %463 = vst.msk [vmem:[#allocation2] sm:$0xf] %vm706_vm0, %v458_v61 }
  0x9b   :  { %v467_v6 = vld [vmem:[#allocation2] sm:$0xf] }
  0x9c   :  { %v472_v13 = vrot.slane %v467_v6, %v471_v18  ;;  %v476_v48 = vrot.slane %v467_v6, %v475_v16  ;;  %v480_v26 = vrot.slane %v467_v6, %v479_v15  ;;  %v484_v33 = vrot.slane %v467_v6, %v483_v51 }
  0x9e   :  { %v489_v20 = vsel %vm390_vm13, %v472_v13, 0.0  ;;  %v490_v24 = vsel %vm390_vm13, %v476_v48, 0.0  ;;  %v492_v8 = vsel %vm390_vm13, %v480_v26, 0.0  ;;  %v494_v21 = vsel %vm390_vm13, %v484_v33, 0.0 }
  0x9f   :  { %v491_v60 = vadd.f32 %v490_v24, %v489_v20 }
  0xa1   :  { %v493_v1 = vadd.f32 %v492_v8, %v491_v60 }
  0xa3   :  { %v495_v32 = vadd.f32 %v494_v21, %v493_v1 }
  0xa5   :  { %496 = vadd.xlane.f32.xlu0 %v495_v32 }
 0x132   :  { %v497_v40 = vpop.xlane.xlu0 %496 }
 0x133   :  { %v498_v35 = vrot.slane %v497_v40, 4 }
 0x135   :  { %v499_v46 = vadd.f32 %v498_v35, %v497_v40 }
 0x137   :  { %v500_v38 = vrot.slane %v499_v46, 2 }
 0x139   :  { %v501_v19 = vadd.f32 %v500_v38, %v499_v46 }
 0x13b   :  { %v502_v58 = vrot.slane %v501_v19, 1 }
 0x13d   :  { %v503_v43 = vadd.f32 %v502_v58, %v501_v19 }
 0x13f   :  { %522 = vpush %v503_v43 }
 0x170   :  { %s523_s1 = spop %522 }
 0x171   :  { %506 = sst [smem:[#allocation8]] %s523_s1 }
 0x172   :  { %650 = shalt.err (!%p647_p4)
}
 0x173   :  { %s665_s15 = smov [#allocation8]  }
 0x174   :  { %514 = dma.smem_to_hbm %s665_s15, 16, %s1168_s2, [#allocation5]  }
 0x175   :  { %655 = dma.done.wait [#allocation5], 16  }
 0x176   :  { %656 = vsyncadd [#allocation5], 4294967280 }
 0x177   :  { %518 = sfence }
 0x178   :  { %519 = vsyncpa [#allocation4], 1 }
 0x179   :  { %520 = vsyncpa [#allocation7], 1 }
 0x17a   :  { %521 = vsyncpa [#allocation5], 1 }

</bundles_post_ra>
